<compile_context>
chip_gen: v5e
topology: v5e:2x2
jax: 0.10.0
libtpu: 0.0.40
codegen_flags: <defaults>
</compile_context>

<pallas_src>
import jax
import jax.numpy as jnp
from jax.experimental import pallas as pl
from jax.experimental.pallas import tpu as pltpu


# ---------------------------------------------------------------------------
# Kernel: one batch tile of out[b, n] = sum_d x[b, d] * QT[d, n]
# ---------------------------------------------------------------------------
def _direction_kernel(x_ref, qt_ref, o_ref):
    qt = qt_ref[...]                       # (D, N) — resident, constant index
    x = x_ref[...].astype(qt.dtype)        # in-kernel cast of the tiny x tile
    o_ref[...] = jnp.dot(
        x, qt, preferred_element_type=jnp.float32
    ).astype(o_ref.dtype)                  # f32 MXU accum, cast on store


# ---------------------------------------------------------------------------
# Parameter preparation (hoisted out of the hot path)
# ---------------------------------------------------------------------------
def prepare_direction_params(weight, *, param_dtype=jnp.float32):
    """weight: (512, D). Returns (Q, QT) with Q: (512, D) f32, QT: (D, 512).

    Call once per weight update; pass QT to `direction_apply` every forward.
    QT is emitted in `param_dtype` so no per-call cast is needed.
    """
    # TODO(synk): Householder QR has no Pallas primitive; it stays in plain JAX
    # and is intentionally hoisted out of the per-step forward.
    w = weight.astype(jnp.float32) + 1e-8
    q, _ = jnp.linalg.qr(w, mode="reduced")            # (512, D), f32
    return q, jnp.transpose(q).astype(param_dtype)      # QT: (D, 512)


def _round_up(v, m):
    return ((v + m - 1) // m) * m


def _pick_tile_b(b, max_tile_b):
    """Batch tile size: full array for small B; >=2 even 128-aligned tiles
    otherwise so v7x's two TensorCores both get work."""
    if b <= 256:
        return b                                        # one tile; launch-bound
    return min(max_tile_b, _round_up(pl.cdiv(b, 2), 128))


# ---------------------------------------------------------------------------
# Forward (hot path): (B, D) @ (D, 512) inside Pallas
# ---------------------------------------------------------------------------
def direction_apply(x, qt, *, out_dtype=jnp.float32, tile_b=None,
                    max_tile_b=2048):
    """x: (B, D), qt: (D, 512) precomputed. Returns (B, 512) in `out_dtype`.

    out_dtype=jnp.bfloat16 halves the dominant HBM stream (the output) while
    keeping f32 MXU accumulation.
    """
    x = jnp.asarray(x)
    qt = jnp.asarray(qt)
    b, d = x.shape
    n = qt.shape[1]

    if tile_b is None:
        tile_b = _pick_tile_b(b, max_tile_b)
    grid = (pl.cdiv(b, tile_b),)

    out_bytes = b * n * jnp.dtype(out_dtype).itemsize
    in_bytes = (x.size * jnp.dtype(x.dtype).itemsize
                + qt.size * jnp.dtype(qt.dtype).itemsize)

    out = pl.pallas_call(
        _direction_kernel,
        out_shape=jax.ShapeDtypeStruct((b, n), out_dtype),
        grid=grid,
        in_specs=[
            pl.BlockSpec((tile_b, d), lambda i: (i, 0)),   # batch-tiled input
            pl.BlockSpec((d, n), lambda i: (0, 0)),        # QT resident (16 KiB)
        ],
        out_specs=pl.BlockSpec((tile_b, n), lambda i: (i, 0)),  # lane-dense 512
        compiler_params=pltpu.CompilerParams(
            dimension_semantics=("parallel",),             # megacore batch split
        ),
        cost_estimate=pl.CostEstimate(
            flops=2 * b * d * n,
            transcendentals=0,
            bytes_accessed=in_bytes + out_bytes,
        ),
    )(x, qt)
    return out


def direction_forward(x, weight, **kwargs):
    """Convenience wrapper matching the PyTorch module interface.

    Prefer calling `prepare_direction_params` once and `direction_apply`
    repeatedly — the QR must not run on every forward.
    """
    q, qt = prepare_direction_params(weight)
    if x is None:
        return q
    return direction_apply(x, qt, **kwargs)


# Latent helpers mirroring the PyTorch module (trivial slices; no kernel needed).
def get_lip_latent(out_shared, lip_dim):
    return jnp.sum(out_shared[:, :lip_dim], axis=1)


def get_pose_latent(out_shared, lip_dim):
    return jnp.sum(out_shared[:, lip_dim:], axis=1)


# ---------------------------------------------------------------------------
# Pure-JAX reference reproducing the PyTorch ops literally
# ---------------------------------------------------------------------------
def direction_forward_ref(x, weight):
    w = weight.astype(jnp.float32) + 1e-8
    q, _ = jnp.linalg.qr(w, mode="reduced")
    if x is None:
        return q
    input_diag = jax.vmap(jnp.diag)(x.astype(jnp.float32))   # (B, D, D)
    out = jnp.matmul(input_diag, q.T)                         # (B, D, 512)
    return jnp.sum(out, axis=1)                               # (B, 512)


# ---------------------------------------------------------------------------
# Demo / self-check
# ---------------------------------------------------------------------------
if __name__ == "__main__":
    lip_dim, pose_dim = 4, 4
    D = lip_dim + pose_dim
    B = 2

    key = jax.random.PRNGKey(0)
    k_w, k_x, k_x2 = jax.random.split(key, 3)
    weight = jax.random.normal(k_w, (512, D), dtype=jnp.float32)
    x = jax.random.normal(k_x, (B, D), dtype=jnp.float32)

    # --- Prepare params once (QR hoisted out of the hot path) ---------------
    Q, QT = prepare_direction_params(weight)
    Q = jax.block_until_ready(Q)
    assert Q.shape == (512, D)

    # `input is None` branch returns Q, as in the PyTorch module.
    q_out = direction_forward(None, weight)
    assert q_out.shape == (512, D)

    ref = jax.block_until_ready(direction_forward_ref(x, weight))

    # --- Small batch, f32 output ---------------------------------------------
    out_f32 = jax.block_until_ready(direction_apply(x, QT))
    assert out_f32.shape == (B, 512), out_f32.shape
    assert out_f32.dtype == jnp.float32
    assert jnp.allclose(out_f32, ref, atol=1e-4, rtol=1e-4), "f32 mismatch"

    # --- Small batch, bf16 output (dominant-stream bandwidth win) ------------
    out_bf16 = jax.block_until_ready(
        direction_apply(x, QT, out_dtype=jnp.bfloat16))
    assert out_bf16.shape == (B, 512)
    assert out_bf16.dtype == jnp.bfloat16
    assert jnp.allclose(out_bf16.astype(jnp.float32), ref,
                        atol=3e-2, rtol=3e-2), "bf16 output mismatch"

    # --- Larger batch: >=2 grid tiles (megacore split) + partial last tile ---
    B2 = 384
    x2 = jax.random.normal(k_x2, (B2, D), dtype=jnp.float32)
    out_big = jax.block_until_ready(direction_apply(x2, QT))
    ref_big = x2 @ QT
    assert out_big.shape == (B2, 512)
    assert jnp.allclose(out_big, ref_big, atol=1e-4, rtol=1e-4), "grid mismatch"

    print("KERNEL_OK")
</pallas_src>

<mosaic_0001>
module attributes {stable_mosaic.version = 11 : i64} {
  func.func @_direction_kernel(%arg0: i32, %arg1: memref<2x8xf32, #tpu.memory_space<vmem>>, %arg2: memref<8x512xf32, #tpu.memory_space<vmem>>, %arg3: memref<2x512xf32, #tpu.memory_space<vmem>>) attributes {dimension_semantics = [#tpu.dimension_semantics<parallel>], iteration_bounds = array<i64: 1>, scalar_prefetch = 0 : i64, scratch_operands = 0 : i64, tpu.core_type = #tpu.core_type<tc>, window_params = [{transform_indices = @transform_0, window_bounds = array<i64: 2, 8>}, {pipeline_mode = #tpu.pipeline_mode<synchronous>, transform_indices = @transform_1, window_bounds = array<i64: 8, 512>}, {transform_indices = @transform_2, window_bounds = array<i64: 2, 512>}]} {
    %c0 = arith.constant 0 : index
    %c0_0 = arith.constant 0 : index
    %0 = vector.load %arg2[%c0, %c0_0] : memref<8x512xf32, #tpu.memory_space<vmem>>, vector<8x512xf32>
    %c0_1 = arith.constant 0 : index
    %c0_2 = arith.constant 0 : index
    %1 = vector.load %arg1[%c0_1, %c0_2] : memref<2x8xf32, #tpu.memory_space<vmem>>, vector<2x8xf32>
    %cst = arith.constant dense<0.000000e+00> : vector<2x512xf32>
    %2 = tpu.matmul %1, %0, %cst {dimension_numbers = #tpu.dot_dimension_numbers<[1], [0], [0], [1], [0, 0, 1, 1], [], []>} : vector<2x8xf32>, vector<8x512xf32>, vector<2x512xf32> -> vector<2x512xf32>
    %c0_3 = arith.constant 0 : index
    %c0_4 = arith.constant 0 : index
    %3 = vector.load %arg3[%c0_3, %c0_4] : memref<2x512xf32, #tpu.memory_space<vmem>>, vector<2x512xf32>
    tpu.vector_store %arg3[%c0_3, %c0_4], %2 {strides = array<i32>} : memref<2x512xf32, #tpu.memory_space<vmem>>, vector<2x512xf32>,
    return
  }
  func.func @transform_0(%arg0: i32) -> (i32, i32) {
    %c0_i32 = arith.constant 0 : i32
    %c0_i32_0 = arith.constant 0 : i32
    return %arg0, %c0_i32 : i32, i32
  }
  func.func @transform_1(%arg0: i32) -> (i32, i32) {
    %c0_i32 = arith.constant 0 : i32
    %c0_i32_0 = arith.constant 0 : i32
    %c0_i32_1 = arith.constant 0 : i32
    return %c0_i32, %c0_i32_0 : i32, i32
  }
  func.func @transform_2(%arg0: i32) -> (i32, i32) {
    %c0_i32 = arith.constant 0 : i32
    %c0_i32_0 = arith.constant 0 : i32
    return %arg0, %c0_i32 : i32, i32
  }
}

</mosaic_0001>

<bundles_post_ra>
// kernel: tpu_custom_call.1
= control target key start
LH: loop header
LB: loop body
LE: loop exit
PB: predicated region body
PF: predicated region fallthrough
CT: control target
= control target key end

     0   :  { %7 = vsyncpa [#allocation3], 0  ;;  %s274_s0 = inlined_call_operand.hbm [shape: f32[2,8], index: 0, kind: input, shape index: {}]   ;;  %s275_s1 = inlined_call_operand.hbm [shape: f32[8,512], index: 1, kind: input, shape index: {}]   ;;  %s276_s2 = inlined_call_operand.hbm [shape: f32[2,512], index: 2, kind: output, shape index: {}]  }
   0x1   :  { %8 = vsyncpa [#allocation6], 0 }
   0x2   :  { %9 = vsyncpa [#allocation4], 0  ;;  %s15_s11 = sshll.u32 %s274_s0, 4  ;;  %s247_s12 = smov [#allocation2]   ;;  %s16_s11 = int_to_ptr.hbm [resolvable:$true] %s15_s11 }
   0x3   :  { %s17_s13 = sshll.u32 %s247_s12, 4  ;;  %s26_s16 = sshll.u32 %s275_s1, 4  ;;  %s18_s13 = int_to_ptr.vmem [resolvable:$true] %s17_s13  ;;  %s27_s16 = int_to_ptr.hbm [resolvable:$true] %s26_s16 }
   0x4   :  { %20 = dma.hbm_to_vmem [thread:$0]  %s16_s11, 32, %s18_s13, [#allocation3]  }
   0x5   :  { %s248_s17 = smov [#allocation5]  }
   0x6   :  { %s28_s18 = sshll.u32 %s248_s17, 4  ;;  %s29_s18 = int_to_ptr.vmem [resolvable:$true] %s28_s18 }
   0x7   :  { %31 = dma.hbm_to_vmem [thread:$0]  %s27_s16, 512, %s29_s18, [#allocation6]  }
   0x8   :  { %241 = dma.done.wait [#allocation3], 32  }
   0x9   :  { %242 = vsyncadd [#allocation3], 4294967264 }
   0xa   :  { %243 = dma.done.wait [#allocation6], 512  }
   0xb   :  { %244 = vsyncadd [#allocation6], 4294966784  ;;  %vm45_vm0 = vcmask 64512   ;;  %v42_v0 = vld [vmem:[#allocation5 + $0x10] sm:$0xff]  ;;  %v43_v1 = vld [vmem:[#allocation5 + $0x18] sm:$0xff]  ;;  %vm136_vm1 = vcmask 1041408  }
   0xc   :  { %v44_v2 = vld [vmem:[#allocation2] sm:$0x3]  ;;  %104 = vmatpush.msra.mxu2 %v42_v0  ;;  %124 = vmatpush.msra.mxu3 %v43_v1  ;;  %v41_v3 = vld [vmem:[#allocation5 + $0x8] sm:$0xff]  ;;  %v40_v4 = vld [vmem:[#allocation5] sm:$0xff]  ;;  %vm138_vm2 = vcmask 1045508   ;;  %s249_s0 = smov [#allocation7]  }
   0xd   :  { %164 = vmatmul.msk.f32.vlgmr.msra.gmra.mxu2 %vm45_vm0, %v44_v2  ;;  %165 = vmatmul.msk.f32.vlgmr.msra.gmra.mxu3 %vm45_vm0, %v44_v2  ;;  %s149_s1 = sshll.u32 %s249_s0, 4  ;;  %s151_s21 = sshll.u32 %s276_s2, 4  ;;  %vm140_vm3 = vcmask 1043456   ;;  %s150_s1 = int_to_ptr.vmem [resolvable:$true] %s149_s1  ;;  %s152_s21 = int_to_ptr.hbm [resolvable:$true] %s151_s21 }
   0xe   :  { %84 = vmatpush.msra.mxu1 %v41_v3  ;;  %64 = vmatpush.msra.mxu0 %v40_v4 }
   0xf   :  { %163 = vmatmul.msk.f32.vlgmr.msra.gmra.mxu1 %vm45_vm0, %v44_v2  ;;  %162 = vmatmul.msk.f32.vlgmr.msra.gmra.mxu0 %vm45_vm0, %v44_v2 }
  0x8c   :  { %v86_v5 = vpop.f32.mrf.mxu1  ;;  %v66_v7 = vpop.f32.mrf.mxu0 }
  0x8d   :  { %v133_v6 = vrot.slane %v86_v5, 6 }
  0x8f   :  { %v137_v12 = vsel %vm136_vm1, %v66_v7, %v133_v6 }
  0x90   :  { %v106_v8 = vpop.f32.mrf.mxu2  ;;  %v126_v9 = vpop.f32.mrf.mxu3 }
  0x91   :  { %v134_v10 = vrot.slane %v106_v8, 4  ;;  %v135_v11 = vrot.slane %v126_v9, 2 }
  0x93   :  { %v139_v13 = vsel %vm138_vm2, %v134_v10, %v135_v11 }
  0x94   :  { %v141_v14 = vsel %vm140_vm3, %v137_v12, %v139_v13 }
  0x95   :  { %143 = vst [vmem:[#allocation7] sm:$0xff] %v141_v14 }
  0x96   :  { %154 = dma.vmem_to_hbm [thread:$0]  %s150_s1, 128, %s152_s21, [#allocation4]  }
  0x97   :  { %245 = dma.done.wait [#allocation4], 128  }
  0x98   :  { %246 = vsyncadd [#allocation4], 4294967168 }
  0x99   :  { %159 = vsyncpa [#allocation3], 1 }
  0x9a   :  { %160 = vsyncpa [#allocation6], 1 }
  0x9b   :  { %161 = vsyncpa [#allocation4], 1 }

</bundles_post_ra>
